<compile_context>
chip_gen: v5e
topology: v5e:2x2
jax: 0.10.0
libtpu: 0.0.40
codegen_flags: <defaults>
</compile_context>

<pallas_src>
import functools
import math

import jax
import jax.numpy as jnp
from jax import lax
from jax.experimental import pallas as pl
from jax.experimental.pallas import tpu as pltpu

MATMUL_DTYPE = jnp.bfloat16   # MXU-native operand dtype; accumulation stays f32.
_MASK_FILL = -1.0e10          # same fill value as the PyTorch masked_fill.


def _mm(a, b):
    """2-D MXU matmul, bf16 operands, f32 accumulation."""
    return jnp.dot(a.astype(MATMUL_DTYPE), b.astype(MATMUL_DTYPE),
                   preferred_element_type=jnp.float32)


def _mm_nt(a, b):
    """a @ b.T without materializing the transpose (MXU NT form)."""
    return lax.dot_general(a.astype(MATMUL_DTYPE), b.astype(MATMUL_DTYPE),
                           (((1,), (1,)), ((), ())),
                           preferred_element_type=jnp.float32)


def _mha_kernel(*refs, head_dim, has_mask, return_attention):
    """One (batch b, head h) grid step.

    Refs (in order): q (1,Lq,H), k (1,Lk,H), v (1,Lk,H), [mask (1,Lq,Lk) i8],
    wq (1,H,hd), bq (1,1,hd), wk, bk, wv, bv, wo (1,hd,H), bo (1,H),
    out (1,Lq,H) f32, [attn (1,1,Lq,Lk)].
    """
    it = iter(refs)
    q_ref, k_ref, v_ref = next(it), next(it), next(it)
    mask_ref = next(it) if has_mask else None
    wq_ref, bq_ref = next(it), next(it)
    wk_ref, bk_ref = next(it), next(it)
    wv_ref, bv_ref = next(it), next(it)
    wo_ref, bo_ref = next(it), next(it)
    out_ref = next(it)
    attn_ref = next(it) if return_attention else None

    h = pl.program_id(1)
    inv_scale = 1.0 / math.sqrt(head_dim)

    # Per-head projections: plain 2-D (L, H) @ (H, hd) MXU matmuls.  No
    # reshapes / swapaxes of activations anywhere in the kernel.
    q_h = (_mm(q_ref[0], wq_ref[0]) + bq_ref[0]) * inv_scale    # (Lq, hd) f32
    k_h = _mm(k_ref[0], wk_ref[0]) + bk_ref[0]                  # (Lk, hd) f32
    v_h = _mm(v_ref[0], wv_ref[0]) + bv_ref[0]                  # (Lk, hd) f32

    energy = _mm_nt(q_h, k_h)                                   # (Lq, Lk) f32
    if has_mask:
        keep = mask_ref[0].astype(jnp.int32)                    # i8 -> i32, VPU
        energy = jnp.where(keep == 0, _MASK_FILL, energy)       # masked_fill

    # Softmax over keys in f32 (exp + reciprocal hit the EUP slot).
    m = jnp.max(energy, axis=-1, keepdims=True)
    e = jnp.exp(energy - m)
    s = jnp.sum(e, axis=-1, keepdims=True)
    p = e * pl.reciprocal(s, approx=True)                       # (Lq, Lk) f32

    if attn_ref is not None:
        attn_ref[0, 0] = p.astype(attn_ref.dtype)               # bf16 by default

    # TODO(synk): dropout on `p` is identity here (inference mode, no in-kernel RNG).

    ctx = _mm(p, v_h)                                           # (Lq, hd) f32
    contrib = _mm(ctx, wo_ref[0])                               # (Lq, H)  f32

    # Output projection decomposes over heads; accumulate in the resident
    # output block (same output block index for all heads of this batch).
    @pl.when(h == 0)
    def _():
        out_ref[0] = contrib + bo_ref[...]

    @pl.when(h != 0)
    def _():
        out_ref[0] = out_ref[0] + contrib


def _split_w(w, n_heads, head_dim):
    """(H_in, H_out) [in, out] -> (n_heads, H_in, head_dim) per-head columns."""
    h_in = w.shape[0]
    return jnp.transpose(w.reshape(h_in, n_heads, head_dim), (1, 0, 2))


def _split_b(b, n_heads, head_dim):
    """(1, H) -> (n_heads, 1, head_dim)."""
    return jnp.transpose(b.reshape(1, n_heads, head_dim), (1, 0, 2))


def multi_head_attention(params, query, key, value, mask=None, *, n_heads,
                         attn_dtype=jnp.bfloat16, return_attention=True):
    """Pallas-backed equivalent of MultiHeadAttentionLayer.forward.

    Returns (x, attention) with x: (B, Lq, H) f32 and attention:
    (B, n_heads, Lq, Lk) in `attn_dtype`; or just x if return_attention=False.
    """
    B, Lq, H = query.shape
    Lk = key.shape[1]
    assert H % n_heads == 0
    head_dim = H // n_heads

    # Head-sliced parameter views (built once, outside the kernel; cheap).
    wq = _split_w(params['wq'], n_heads, head_dim)   # (nh, H, hd)
    wk = _split_w(params['wk'], n_heads, head_dim)
    wv = _split_w(params['wv'], n_heads, head_dim)
    bq = _split_b(params['bq'], n_heads, head_dim)   # (nh, 1, hd)
    bk = _split_b(params['bk'], n_heads, head_dim)
    bv = _split_b(params['bv'], n_heads, head_dim)
    wo = params['wo'].reshape(n_heads, head_dim, H)  # per-head rows (pure reshape)
    bo = params['bo']                                # (1, H)

    has_mask = mask is not None
    operands = [query, key, value]
    if has_mask:
        m4 = jnp.broadcast_to(mask, (B, 1, Lq, Lk))[:, 0]
        operands.append((m4 != 0).astype(jnp.int8))  # 1 = keep, 0 = masked
    operands += [wq, bq, wk, bk, wv, bv, wo, bo]

    act_q = pl.BlockSpec((1, Lq, H), lambda b, h: (b, 0, 0))
    act_k = pl.BlockSpec((1, Lk, H), lambda b, h: (b, 0, 0))
    w_in = pl.BlockSpec((1, H, head_dim), lambda b, h: (h, 0, 0))
    b_in = pl.BlockSpec((1, 1, head_dim), lambda b, h: (h, 0, 0))
    w_out = pl.BlockSpec((1, head_dim, H), lambda b, h: (h, 0, 0))
    b_out = pl.BlockSpec((1, H), lambda b, h: (0, 0))

    in_specs = [act_q, act_k, act_k]
    if has_mask:
        in_specs.append(pl.BlockSpec((1, Lq, Lk), lambda b, h: (b, 0, 0)))
    in_specs += [w_in, b_in, w_in, b_in, w_in, b_in, w_out, b_out]

    out_shape = [jax.ShapeDtypeStruct((B, Lq, H), jnp.float32)]
    out_specs = [pl.BlockSpec((1, Lq, H), lambda b, h: (b, 0, 0))]
    if return_attention:
        out_shape.append(jax.ShapeDtypeStruct((B, n_heads, Lq, Lk), attn_dtype))
        out_specs.append(pl.BlockSpec((1, 1, Lq, Lk), lambda b, h: (b, h, 0, 0)))

    # Advisory cost hint for XLA's scheduler around the custom call.
    flops = B * (4 * H * H * (Lq + Lk) + 4 * Lq * Lk * H)
    bytes_accessed = (4 * B * (Lq + 2 * Lk) * H            # f32 activations in
                      + (B * Lq * Lk if has_mask else 0)   # int8 mask
                      + 2 * B * 4 * H * H                  # bf16 weight streams
                      + 4 * B * Lq * H)                    # f32 output
    if return_attention:
        bytes_accessed += B * n_heads * Lq * Lk * jnp.dtype(attn_dtype).itemsize
    cost = pl.CostEstimate(flops=flops,
                           transcendentals=B * n_heads * Lq * Lk,
                           bytes_accessed=bytes_accessed)

    kernel = functools.partial(_mha_kernel, head_dim=head_dim,
                               has_mask=has_mask,
                               return_attention=return_attention)

    outs = pl.pallas_call(
        kernel,
        grid=(B, n_heads),
        in_specs=in_specs,
        out_specs=tuple(out_specs),
        out_shape=tuple(out_shape),
        compiler_params=pltpu.CompilerParams(
            # batch parallel (megacore), heads arbitrary (output accumulation).
            dimension_semantics=("parallel", "arbitrary"),
            # Above the 16/32 MiB defaults, below every generation's physical VMEM.
            vmem_limit_bytes=48 * 1024 * 1024),
        cost_estimate=cost,
    )(*operands)

    if return_attention:
        return outs[0], outs[1]
    return outs[0]


def init_mha_params(rng, hid_dim, w_scale=0.05):
    ks = jax.random.split(rng, 8)

    def w(k):  # weight matrices stored [in, out] (torch W^T), bf16 for the MXU/DMA
        return (jax.random.normal(k, (hid_dim, hid_dim), jnp.float32)
                * w_scale).astype(MATMUL_DTYPE)

    def b(k):  # biases stay f32 (added to f32 accumulators)
        return jax.random.normal(k, (1, hid_dim), jnp.float32) * w_scale

    return dict(wq=w(ks[0]), bq=b(ks[1]),
                wk=w(ks[2]), bk=b(ks[3]),
                wv=w(ks[4]), bv=b(ks[5]),
                wo=w(ks[6]), bo=b(ks[7]))


if __name__ == "__main__":
    HID_DIM = 64
    N_HEADS = 4
    B, LQ, LK = 2, 16, 16     # self-attention demo: query = key = value

    root = jax.random.PRNGKey(0)
    k_param, k_x = jax.random.split(root, 2)

    params = init_mha_params(k_param, HID_DIM)
    x = jax.random.normal(k_x, (B, LQ, HID_DIM), jnp.float32)

    # Causal mask in the same (B, 1, Lq, Lk) convention as the PyTorch call site.
    mask = jnp.broadcast_to(
        jnp.tril(jnp.ones((LQ, LK), jnp.float32))[None, None], (B, 1, LQ, LK))

    out, attn = multi_head_attention(params, x, x, x, mask, n_heads=N_HEADS)
    jax.block_until_ready((out, attn))

    assert out.shape == (B, LQ, HID_DIM)
    assert attn.shape == (B, N_HEADS, LQ, LK)
    assert out.dtype == jnp.float32 and attn.dtype == jnp.bfloat16
    assert bool(jnp.all(jnp.isfinite(out)))
    # softmax rows sum to ~1 (tolerance covers bf16 storage + approx reciprocal)
    row_sums = jnp.sum(attn.astype(jnp.float32), axis=-1)
    assert bool(jnp.allclose(row_sums, 1.0, atol=2e-2))
    # causal mask respected: upper triangle of attention is (numerically) zero
    assert bool(jnp.all(attn.astype(jnp.float32)[0, 0, 0, 1:] < 1e-6))

    # Optional-output path: no mask, no attention-probability writeback.
    out2 = multi_head_attention(params, x, x, x, None, n_heads=N_HEADS,
                                return_attention=False)
    jax.block_until_ready(out2)
    assert out2.shape == (B, LQ, HID_DIM)
    assert bool(jnp.all(jnp.isfinite(out2)))

    print("KERNEL_OK")
</pallas_src>

<mosaic_0001>
module attributes {stable_mosaic.version = 11 : i64} {
  func.func @_mha_kernel(%arg0: i32, %arg1: i32, %arg2: memref<1x16x64xf32, #tpu.memory_space<vmem>>, %arg3: memref<1x16x64xf32, #tpu.memory_space<vmem>>, %arg4: memref<1x16x64xf32, #tpu.memory_space<vmem>>, %arg5: memref<1x16x16xi8, #tpu.memory_space<vmem>>, %arg6: memref<1x64x16xbf16, #tpu.memory_space<vmem>>, %arg7: memref<1x1x16xf32, #tpu.memory_space<vmem>>, %arg8: memref<1x64x16xbf16, #tpu.memory_space<vmem>>, %arg9: memref<1x1x16xf32, #tpu.memory_space<vmem>>, %arg10: memref<1x64x16xbf16, #tpu.memory_space<vmem>>, %arg11: memref<1x1x16xf32, #tpu.memory_space<vmem>>, %arg12: memref<1x16x64xbf16, #tpu.memory_space<vmem>>, %arg13: memref<1x64xf32, #tpu.memory_space<vmem>>, %arg14: memref<1x16x64xf32, #tpu.memory_space<vmem>>, %arg15: memref<1x1x16x16xbf16, #tpu.memory_space<vmem>>) attributes {dimension_semantics = [#tpu.dimension_semantics<parallel>, #tpu.dimension_semantics<arbitrary>], iteration_bounds = array<i64: 2, 4>, scalar_prefetch = 0 : i64, scratch_operands = 0 : i64, tpu.core_type = #tpu.core_type<tc>, window_params = [{transform_indices = @transform_0, window_bounds = array<i64: 1, 16, 64>}, {transform_indices = @transform_1, window_bounds = array<i64: 1, 16, 64>}, {transform_indices = @transform_2, window_bounds = array<i64: 1, 16, 64>}, {transform_indices = @transform_3, window_bounds = array<i64: 1, 16, 16>}, {transform_indices = @transform_4, window_bounds = array<i64: 1, 64, 16>}, {transform_indices = @transform_5, window_bounds = array<i64: 1, 1, 16>}, {transform_indices = @transform_6, window_bounds = array<i64: 1, 64, 16>}, {transform_indices = @transform_7, window_bounds = array<i64: 1, 1, 16>}, {transform_indices = @transform_8, window_bounds = array<i64: 1, 64, 16>}, {transform_indices = @transform_9, window_bounds = array<i64: 1, 1, 16>}, {transform_indices = @transform_10, window_bounds = array<i64: 1, 16, 64>}, {pipeline_mode = #tpu.pipeline_mode<synchronous>, transform_indices = @transform_11, window_bounds = array<i64: 1, 64>}, {transform_indices = @transform_12, window_bounds = array<i64: 1, 16, 64>}, {transform_indices = @transform_13, window_bounds = array<i64: 1, 1, 16, 16>}]} {
    %c0 = arith.constant 0 : index
    %c0_0 = arith.constant 0 : index
    %c0_1 = arith.constant 0 : index
    %0 = vector.load %arg2[%c0, %c0_0, %c0_1] : memref<1x16x64xf32, #tpu.memory_space<vmem>>, vector<1x16x64xf32>
    %1 = vector.shape_cast %0 : vector<1x16x64xf32> to vector<16x64xf32>
    %c0_2 = arith.constant 0 : index
    %c0_3 = arith.constant 0 : index
    %c0_4 = arith.constant 0 : index
    %2 = vector.load %arg6[%c0_2, %c0_3, %c0_4] : memref<1x64x16xbf16, #tpu.memory_space<vmem>>, vector<1x64x16xbf16>
    %3 = vector.shape_cast %2 : vector<1x64x16xbf16> to vector<64x16xbf16>
    %4 = arith.truncf %1 : vector<16x64xf32> to vector<16x64xbf16>
    %cst = arith.constant dense<0.000000e+00> : vector<16x16xf32>
    %5 = tpu.matmul %4, %3, %cst {dimension_numbers = #tpu.dot_dimension_numbers<[1], [0], [0], [1], [0, 0, 1, 1], [], []>} : vector<16x64xbf16>, vector<64x16xbf16>, vector<16x16xf32> -> vector<16x16xf32>
    %c0_5 = arith.constant 0 : index
    %c0_6 = arith.constant 0 : index
    %c0_7 = arith.constant 0 : index
    %6 = vector.load %arg7[%c0_5, %c0_6, %c0_7] : memref<1x1x16xf32, #tpu.memory_space<vmem>>, vector<1x1x16xf32>
    %7 = vector.shape_cast %6 : vector<1x1x16xf32> to vector<1x16xf32>
    %8 = vector.broadcast %7 : vector<1x16xf32> to vector<16x16xf32>
    %9 = arith.addf %5, %8 : vector<16x16xf32>
    %cst_8 = arith.constant 2.500000e-01 : f32
    %10 = vector.broadcast %cst_8 : f32 to vector<16x16xf32>
    %11 = arith.mulf %9, %10 : vector<16x16xf32>
    %c0_9 = arith.constant 0 : index
    %c0_10 = arith.constant 0 : index
    %c0_11 = arith.constant 0 : index
    %12 = vector.load %arg3[%c0_9, %c0_10, %c0_11] : memref<1x16x64xf32, #tpu.memory_space<vmem>>, vector<1x16x64xf32>
    %13 = vector.shape_cast %12 : vector<1x16x64xf32> to vector<16x64xf32>
    %c0_12 = arith.constant 0 : index
    %c0_13 = arith.constant 0 : index
    %c0_14 = arith.constant 0 : index
    %14 = vector.load %arg8[%c0_12, %c0_13, %c0_14] : memref<1x64x16xbf16, #tpu.memory_space<vmem>>, vector<1x64x16xbf16>
    %15 = vector.shape_cast %14 : vector<1x64x16xbf16> to vector<64x16xbf16>
    %16 = arith.truncf %13 : vector<16x64xf32> to vector<16x64xbf16>
    %cst_15 = arith.constant dense<0.000000e+00> : vector<16x16xf32>
    %17 = tpu.matmul %16, %15, %cst_15 {dimension_numbers = #tpu.dot_dimension_numbers<[1], [0], [0], [1], [0, 0, 1, 1], [], []>} : vector<16x64xbf16>, vector<64x16xbf16>, vector<16x16xf32> -> vector<16x16xf32>
    %c0_16 = arith.constant 0 : index
    %c0_17 = arith.constant 0 : index
    %c0_18 = arith.constant 0 : index
    %18 = vector.load %arg9[%c0_16, %c0_17, %c0_18] : memref<1x1x16xf32, #tpu.memory_space<vmem>>, vector<1x1x16xf32>
    %19 = vector.shape_cast %18 : vector<1x1x16xf32> to vector<1x16xf32>
    %20 = vector.broadcast %19 : vector<1x16xf32> to vector<16x16xf32>
    %21 = arith.addf %17, %20 : vector<16x16xf32>
    %c0_19 = arith.constant 0 : index
    %c0_20 = arith.constant 0 : index
    %c0_21 = arith.constant 0 : index
    %22 = vector.load %arg4[%c0_19, %c0_20, %c0_21] : memref<1x16x64xf32, #tpu.memory_space<vmem>>, vector<1x16x64xf32>
    %23 = vector.shape_cast %22 : vector<1x16x64xf32> to vector<16x64xf32>
    %c0_22 = arith.constant 0 : index
    %c0_23 = arith.constant 0 : index
    %c0_24 = arith.constant 0 : index
    %24 = vector.load %arg10[%c0_22, %c0_23, %c0_24] : memref<1x64x16xbf16, #tpu.memory_space<vmem>>, vector<1x64x16xbf16>
    %25 = vector.shape_cast %24 : vector<1x64x16xbf16> to vector<64x16xbf16>
    %26 = arith.truncf %23 : vector<16x64xf32> to vector<16x64xbf16>
    %cst_25 = arith.constant dense<0.000000e+00> : vector<16x16xf32>
    %27 = tpu.matmul %26, %25, %cst_25 {dimension_numbers = #tpu.dot_dimension_numbers<[1], [0], [0], [1], [0, 0, 1, 1], [], []>} : vector<16x64xbf16>, vector<64x16xbf16>, vector<16x16xf32> -> vector<16x16xf32>
    %c0_26 = arith.constant 0 : index
    %c0_27 = arith.constant 0 : index
    %c0_28 = arith.constant 0 : index
    %28 = vector.load %arg11[%c0_26, %c0_27, %c0_28] : memref<1x1x16xf32, #tpu.memory_space<vmem>>, vector<1x1x16xf32>
    %29 = vector.shape_cast %28 : vector<1x1x16xf32> to vector<1x16xf32>
    %30 = vector.broadcast %29 : vector<1x16xf32> to vector<16x16xf32>
    %31 = arith.addf %27, %30 : vector<16x16xf32>
    %32 = arith.truncf %11 : vector<16x16xf32> to vector<16x16xbf16>
    %33 = arith.truncf %21 : vector<16x16xf32> to vector<16x16xbf16>
    %cst_29 = arith.constant dense<0.000000e+00> : vector<16x16xf32>
    %34 = tpu.matmul %32, %33, %cst_29 {dimension_numbers = #tpu.dot_dimension_numbers<[1], [1], [0], [0], [0, 0, 1, 0], [], []>} : vector<16x16xbf16>, vector<16x16xbf16>, vector<16x16xf32> -> vector<16x16xf32>
    %c0_30 = arith.constant 0 : index
    %c0_31 = arith.constant 0 : index
    %c0_32 = arith.constant 0 : index
    %35 = vector.load %arg5[%c0_30, %c0_31, %c0_32] : memref<1x16x16xi8, #tpu.memory_space<vmem>>, vector<1x16x16xi8>
    %36 = vector.shape_cast %35 : vector<1x16x16xi8> to vector<16x16xi8>
    %37 = arith.extsi %36 : vector<16x16xi8> to vector<16x16xi32>
    %c0_i32 = arith.constant 0 : i32
    %38 = vector.broadcast %c0_i32 : i32 to vector<16x16xi32>
    %39 = arith.cmpi eq, %37, %38 : vector<16x16xi32>
    %cst_33 = arith.constant -1.000000e+10 : f32
    %40 = vector.broadcast %cst_33 : f32 to vector<16x16xf32>
    %41 = arith.select %39, %40, %34 : vector<16x16xi1>, vector<16x16xf32>
    %cst_34 = arith.constant dense<0xFF800000> : vector<16xf32>
    %42 = vector.multi_reduction <maximumf>, %41, %cst_34 [1] : vector<16x16xf32> to vector<16xf32>
    %43 = vector.shape_cast %42 : vector<16xf32> to vector<16x1xf32>
    %44 = vector.broadcast %43 : vector<16x1xf32> to vector<16x16xf32>
    %45 = arith.subf %41, %44 : vector<16x16xf32>
    %46 = math.exp %45 : vector<16x16xf32>
    %cst_35 = arith.constant dense<0.000000e+00> : vector<16xf32>
    %47 = vector.multi_reduction <add>, %46, %cst_35 [1] : vector<16x16xf32> to vector<16xf32>
    %48 = vector.shape_cast %47 : vector<16xf32> to vector<16x1xf32>
    %49 = tpu.reciprocal %48 {approx = true} : vector<16x1xf32> -> vector<16x1xf32>
    %50 = vector.broadcast %49 : vector<16x1xf32> to vector<16x16xf32>
    %51 = arith.mulf %46, %50 : vector<16x16xf32>
    %52 = arith.truncf %51 : vector<16x16xf32> to vector<16x16xbf16>
    %c0_36 = arith.constant 0 : index
    %c0_37 = arith.constant 0 : index
    %c0_38 = arith.constant 0 : index
    %c0_39 = arith.constant 0 : index
    %53 = vector.load %arg15[%c0_36, %c0_37, %c0_38, %c0_39] : memref<1x1x16x16xbf16, #tpu.memory_space<vmem>>, vector<1x1x16x16xbf16>
    %54 = vector.shape_cast %53 : vector<1x1x16x16xbf16> to vector<16x16xbf16>
    %55 = vector.shape_cast %52 : vector<16x16xbf16> to vector<1x1x16x16xbf16>
    tpu.vector_store %arg15[%c0_36, %c0_37, %c0_38, %c0_39], %55 {strides = array<i32>} : memref<1x1x16x16xbf16, #tpu.memory_space<vmem>>, vector<1x1x16x16xbf16>,
    %56 = arith.truncf %51 : vector<16x16xf32> to vector<16x16xbf16>
    %57 = arith.truncf %31 : vector<16x16xf32> to vector<16x16xbf16>
    %cst_40 = arith.constant dense<0.000000e+00> : vector<16x16xf32>
    %58 = tpu.matmul %56, %57, %cst_40 {dimension_numbers = #tpu.dot_dimension_numbers<[1], [0], [0], [1], [0, 0, 1, 1], [], []>} : vector<16x16xbf16>, vector<16x16xbf16>, vector<16x16xf32> -> vector<16x16xf32>
    %c0_41 = arith.constant 0 : index
    %c0_42 = arith.constant 0 : index
    %c0_43 = arith.constant 0 : index
    %59 = vector.load %arg12[%c0_41, %c0_42, %c0_43] : memref<1x16x64xbf16, #tpu.memory_space<vmem>>, vector<1x16x64xbf16>
    %60 = vector.shape_cast %59 : vector<1x16x64xbf16> to vector<16x64xbf16>
    %61 = arith.truncf %58 : vector<16x16xf32> to vector<16x16xbf16>
    %cst_44 = arith.constant dense<0.000000e+00> : vector<16x64xf32>
    %62 = tpu.matmul %61, %60, %cst_44 {dimension_numbers = #tpu.dot_dimension_numbers<[1], [0], [0], [1], [0, 0, 1, 1], [], []>} : vector<16x16xbf16>, vector<16x64xbf16>, vector<16x64xf32> -> vector<16x64xf32>
    %c0_i32_45 = arith.constant 0 : i32
    %63 = arith.cmpi eq, %arg1, %c0_i32_45 : i32
    %64 = arith.extui %63 : i1 to i32
    %c0_i32_46 = arith.constant 0 : i32
    %65 = arith.cmpi ne, %64, %c0_i32_46 : i32
    scf.if %65 {
      %c0_49 = arith.constant 0 : index
      %c0_50 = arith.constant 0 : index
      %69 = vector.load %arg13[%c0_49, %c0_50] : memref<1x64xf32, #tpu.memory_space<vmem>>, vector<1x64xf32>
      %70 = vector.broadcast %69 : vector<1x64xf32> to vector<16x64xf32>
      %71 = arith.addf %62, %70 : vector<16x64xf32>
      %c0_51 = arith.constant 0 : index
      %c0_52 = arith.constant 0 : index
      %c0_53 = arith.constant 0 : index
      %72 = vector.load %arg14[%c0_51, %c0_52, %c0_53] : memref<1x16x64xf32, #tpu.memory_space<vmem>>, vector<1x16x64xf32>
      %73 = vector.shape_cast %72 : vector<1x16x64xf32> to vector<16x64xf32>
      %74 = vector.shape_cast %71 : vector<16x64xf32> to vector<1x16x64xf32>
      tpu.vector_store %arg14[%c0_51, %c0_52, %c0_53], %74 {strides = array<i32>} : memref<1x16x64xf32, #tpu.memory_space<vmem>>, vector<1x16x64xf32>,
    } else {
    }
    %c0_i32_47 = arith.constant 0 : i32
    %66 = arith.cmpi ne, %arg1, %c0_i32_47 : i32
    %67 = arith.extui %66 : i1 to i32
    %c0_i32_48 = arith.constant 0 : i32
    %68 = arith.cmpi ne, %67, %c0_i32_48 : i32
    scf.if %68 {
      %c0_49 = arith.constant 0 : index
      %c0_50 = arith.constant 0 : index
      %c0_51 = arith.constant 0 : index
      %69 = vector.load %arg14[%c0_49, %c0_50, %c0_51] : memref<1x16x64xf32, #tpu.memory_space<vmem>>, vector<1x16x64xf32>
      %70 = vector.shape_cast %69 : vector<1x16x64xf32> to vector<16x64xf32>
      %71 = arith.addf %70, %62 : vector<16x64xf32>
      %c0_52 = arith.constant 0 : index
      %c0_53 = arith.constant 0 : index
      %c0_54 = arith.constant 0 : index
      %72 = vector.load %arg14[%c0_52, %c0_53, %c0_54] : memref<1x16x64xf32, #tpu.memory_space<vmem>>, vector<1x16x64xf32>
      %73 = vector.shape_cast %72 : vector<1x16x64xf32> to vector<16x64xf32>
      %74 = vector.shape_cast %71 : vector<16x64xf32> to vector<1x16x64xf32>
      tpu.vector_store %arg14[%c0_52, %c0_53, %c0_54], %74 {strides = array<i32>} : memref<1x16x64xf32, #tpu.memory_space<vmem>>, vector<1x16x64xf32>,
    } else {
    }
    return
  }
  func.func @transform_0(%arg0: i32, %arg1: i32) -> (i32, i32, i32) {
    %c0_i32 = arith.constant 0 : i32
    %c0_i32_0 = arith.constant 0 : i32
    %c0_i32_1 = arith.constant 0 : i32
    return %arg0, %c0_i32, %c0_i32_0 : i32, i32, i32
  }
  func.func @transform_1(%arg0: i32, %arg1: i32) -> (i32, i32, i32) {
    %c0_i32 = arith.constant 0 : i32
    %c0_i32_0 = arith.constant 0 : i32
    %c0_i32_1 = arith.constant 0 : i32
    return %arg0, %c0_i32, %c0_i32_0 : i32, i32, i32
  }
  func.func @transform_2(%arg0: i32, %arg1: i32) -> (i32, i32, i32) {
    %c0_i32 = arith.constant 0 : i32
    %c0_i32_0 = arith.constant 0 : i32
    %c0_i32_1 = arith.constant 0 : i32
    return %arg0, %c0_i32, %c0_i32_0 : i32, i32, i32
  }
  func.func @transform_3(%arg0: i32, %arg1: i32) -> (i32, i32, i32) {
    %c0_i32 = arith.constant 0 : i32
    %c0_i32_0 = arith.constant 0 : i32
    %c0_i32_1 = arith.constant 0 : i32
    return %arg0, %c0_i32, %c0_i32_0 : i32, i32, i32
  }
  func.func @transform_4(%arg0: i32, %arg1: i32) -> (i32, i32, i32) {
    %c0_i32 = arith.constant 0 : i32
    %c0_i32_0 = arith.constant 0 : i32
    %c0_i32_1 = arith.constant 0 : i32
    return %arg1, %c0_i32, %c0_i32_0 : i32, i32, i32
  }
  func.func @transform_5(%arg0: i32, %arg1: i32) -> (i32, i32, i32) {
    %c0_i32 = arith.constant 0 : i32
    %c0_i32_0 = arith.constant 0 : i32
    %c0_i32_1 = arith.constant 0 : i32
    return %arg1, %c0_i32, %c0_i32_0 : i32, i32, i32
  }
  func.func @transform_6(%arg0: i32, %arg1: i32) -> (i32, i32, i32) {
    %c0_i32 = arith.constant 0 : i32
    %c0_i32_0 = arith.constant 0 : i32
    %c0_i32_1 = arith.constant 0 : i32
    return %arg1, %c0_i32, %c0_i32_0 : i32, i32, i32
  }
  func.func @transform_7(%arg0: i32, %arg1: i32) -> (i32, i32, i32) {
    %c0_i32 = arith.constant 0 : i32
    %c0_i32_0 = arith.constant 0 : i32
    %c0_i32_1 = arith.constant 0 : i32
    return %arg1, %c0_i32, %c0_i32_0 : i32, i32, i32
  }
  func.func @transform_8(%arg0: i32, %arg1: i32) -> (i32, i32, i32) {
    %c0_i32 = arith.constant 0 : i32
    %c0_i32_0 = arith.constant 0 : i32
    %c0_i32_1 = arith.constant 0 : i32
    return %arg1, %c0_i32, %c0_i32_0 : i32, i32, i32
  }
  func.func @transform_9(%arg0: i32, %arg1: i32) -> (i32, i32, i32) {
    %c0_i32 = arith.constant 0 : i32
    %c0_i32_0 = arith.constant 0 : i32
    %c0_i32_1 = arith.constant 0 : i32
    return %arg1, %c0_i32, %c0_i32_0 : i32, i32, i32
  }
  func.func @transform_10(%arg0: i32, %arg1: i32) -> (i32, i32, i32) {
    %c0_i32 = arith.constant 0 : i32
    %c0_i32_0 = arith.constant 0 : i32
    %c0_i32_1 = arith.constant 0 : i32
    return %arg1, %c0_i32, %c0_i32_0 : i32, i32, i32
  }
  func.func @transform_11(%arg0: i32, %arg1: i32) -> (i32, i32) {
    %c0_i32 = arith.constant 0 : i32
    %c0_i32_0 = arith.constant 0 : i32
    %c0_i32_1 = arith.constant 0 : i32
    return %c0_i32, %c0_i32_0 : i32, i32
  }
  func.func @transform_12(%arg0: i32, %arg1: i32) -> (i32, i32, i32) {
    %c0_i32 = arith.constant 0 : i32
    %c0_i32_0 = arith.constant 0 : i32
    %c0_i32_1 = arith.constant 0 : i32
    return %arg0, %c0_i32, %c0_i32_0 : i32, i32, i32
  }
  func.func @transform_13(%arg0: i32, %arg1: i32) -> (i32, i32, i32, i32) {
    %c0_i32 = arith.constant 0 : i32
    %c0_i32_0 = arith.constant 0 : i32
    %c0_i32_1 = arith.constant 0 : i32
    return %arg0, %arg1, %c0_i32, %c0_i32_0 : i32, i32, i32, i32
  }
}

</mosaic_0001>

<bundles_post_ra>
// kernel: tpu_custom_call.1
= control target key start
LH: loop header
LB: loop body
LE: loop exit
PB: predicated region body
PF: predicated region fallthrough
CT: control target
= control target key end

     0   :  { %s1955_s0 = inlined_call_operand.vmem [shape: f32[2,16,64], index: 0, kind: input, shape index: {}]   ;;  %s1956_s1 = inlined_call_operand.vmem [shape: f32[2,16,64], index: 1, kind: input, shape index: {}]   ;;  %s1957_s2 = inlined_call_operand.vmem [shape: f32[2,16,64], index: 2, kind: input, shape index: {}]   ;;  %s1958_s3 = inlined_call_operand.vmem [shape: s8[2,16,16], index: 3, kind: input, shape index: {}]   ;;  %s1959_s4 = inlined_call_operand.vmem [shape: bf16[4,64,16], index: 4, kind: input, shape index: {}]   ;;  %s1960_s5 = inlined_call_operand.vmem [shape: f32[4,1,16], index: 5, kind: input, shape index: {}]   ;;  %s1961_s6 = inlined_call_operand.vmem [shape: bf16[4,64,16], index: 6, kind: input, shape index: {}]   ;;  %s1962_s7 = inlined_call_operand.vmem [shape: f32[4,1,16], index: 7, kind: input, shape index: {}]   ;;  %s1963_s8 = inlined_call_operand.vmem [shape: bf16[4,64,16], index: 8, kind: input, shape index: {}]   ;;  %s1964_s9 = inlined_call_operand.vmem [shape: f32[4,1,16], index: 9, kind: input, shape index: {}]   ;;  %s1965_s10 = inlined_call_operand.vmem [shape: bf16[4,16,64], index: 10, kind: input, shape index: {}]   ;;  %s1966_s11 = inlined_call_operand.vmem [shape: f32[1,64], index: 11, kind: input, shape index: {}]   ;;  %s1967_s12 = inlined_call_operand.hbm [shape: f32[2,16,64], index: 12, kind: output, shape index: {0}]   ;;  %s1968_s13 = inlined_call_operand.hbm [shape: bf16[2,4,16,16], index: 13, kind: output, shape index: {1}]  }
   0x1   :  { %1984 = sst [smem:[#allocation19_spill]] %s1955_s0 }
   0x2   :  { %1985 = sst [smem:[#allocation20_spill]] %s1956_s1 }
   0x3   :  { %1986 = sst [smem:[#allocation21_spill]] %s1957_s2 }
   0x4   :  { %1987 = sst [smem:[#allocation22_spill]] %s1958_s3 }
   0x5   :  { %1988 = sst [smem:[#allocation23_spill]] %s1959_s4 }
   0x6   :  { %1989 = sst [smem:[#allocation24_spill]] %s1960_s5 }
   0x7   :  { %1990 = sst [smem:[#allocation25_spill]] %s1961_s6 }
   0x8   :  { %1991 = sst [smem:[#allocation26_spill]] %s1964_s9 }
   0x9   :  { %1992 = sst [smem:[#allocation27_spill]] %s1965_s10 }
   0xa   :  { %1993 = sst [smem:[#allocation28_spill]] %s1966_s11 }
   0xb   :  { %1994 = sst [smem:[#allocation29_spill]] %s1967_s12 }
   0xc   :  { %1995 = sst [smem:[#allocation30_spill]] %s1968_s13 }
   0xd   :  { %19 = vsyncpa [#allocation3], 0 }
   0xe   :  { %21 = vsyncpa [#allocation3 + $0x1], 0 }
   0xf   :  { %22 = vsyncpa [#allocation5], 0 }
  0x10   :  { %24 = vsyncpa [#allocation5 + $0x1], 0  ;;  %s1667_s25 = smov 0   ;;  %s1669_s26 = smov 0  }
  0x11   :  { %s1671_s27 = smov 0   ;;  %s1673_s28 = smov 0  }
  0x12   :  { %s1675_s29 = smov 0   ;;  %s1677_s30 = smov 0  }
  0x13   :  { %s1679_s14 = smov 0   ;;  %s1681_s15 = smov 0  }
  0x14   :  { %s1683_s16 = smov 0   ;;  %s1685_s17 = smov 0  }
  0x15   :  { %s1687_s18 = smov 0  }
  0x16 LB: > { %1996 = sst [smem:[#allocation8_spill]] %s1559_s27  ;;  %s1207_s19 = sadd.s32 4294967295, %s1591_s18   ;;  %s1591_s18 = sphi %s1687_s18, %s30_s18   ;;  %s1587_s17 = sphi %s1685_s17, %s2038_s17   ;;  %s1583_s16 = sphi %s1683_s16, %s2037_s16   ;;  %s1579_s15 = sphi %s1681_s15, %s2036_s15   ;;  %s1575_s14 = sphi %s1679_s14, %s2035_s14   ;;  %s1571_s30 = sphi %s1677_s30, %s2034_s30   ;;  %s1567_s29 = sphi %s1675_s29, %s2042_s29   ;;  %s1563_s28 = sphi %s1673_s28, %s2041_s28   ;;  %s1559_s27 = sphi %s1671_s27, %s2032_s27   ;;  %s1555_s26 = sphi %s1669_s26, %s2040_s26   ;;  %s1551_s25 = sphi %s1667_s25, %s2039_s25  }
  0x17   : > { %1997 = sst [smem:[#allocation9_spill]] %s1563_s28  ;;  %s1208_s20 = sadd.s32 4294967294, %s1591_s18  }
  0x18   : > { %1998 = sst [smem:[#allocation10_spill]] %s1571_s30  ;;  %s39_s21 = sadd.s32 1, %s1583_s16 }
  0x19   : > { %1999 = sst [smem:[#allocation11_spill]] %s1583_s16  ;;  %s42_s22 = sadd.s32 1, %s1587_s17 }
  0x1a   : > { %2000 = sst [smem:[#allocation12_spill]] %s1587_s17  ;;  %p40_p0 = scmp.ge.s32.totalorder %s39_s21, 4 }
  0x1b   : > { %s356_s23 = sadd.s32 1, %s1571_s30  ;;  %p366_p1 = scmp.ne.s32.totalorder %s1571_s30, %s1567_s29 }
  0x1c   : > { %p1729_p2 = scmp.eq.s32.totalorder %s1207_s19, 7  ;;  %s2044_s21 = smov (%p40_p0, %s39_s21), 0 }
  0x1d   : > { %2002 = sst [smem:[#allocation13_spill]] %s2044_s21  ;;  %s2046_s22 = smov (!%p40_p0, %s42_s22), %s1587_s17 }
  0x1e   : > { %p1738_p3 = por %p1729_p2, %p366_p1  ;;  %p372_p4 = scmp.ne.s32.totalorder %s1567_s29, %s1563_s28 }
  0x1f   : > { %p44_p5 = scmp.ge.s32.totalorder %s2046_s22, 2  ;;  %p1744_p6 = scmp.eq.s32.totalorder %s1208_s20, 7 }
  0x20   : > { %s2003_s13 = scalar_select %p1738_p3, 1, 0 }
  0x21   : > { %s380_s12 = ssub.s32 %s1583_s16, %s2044_s21  ;;  %s384_s11 = sadd.s32 1, %s1559_s27 }
  0x22   : > { %2004 = sst [smem:[#allocation14_spill]] %s2003_s13  ;;  %s2048_s22 = smov (%p44_p5, %s2046_s22), 0 }
  0x23   : > { %2006 = sst [smem:[#allocation15_spill]] %s2048_s22  ;;  %p1755_p7 = por %p1744_p6, %p372_p4 }
  0x24   : > { %p394_p8 = scmp.ne.s32.totalorder %s1559_s27, %s1555_s26  ;;  %s353_s28 = ssub.s32 %s1587_s17, %s2048_s22 }
  0x25   : > { %p400_p9 = scmp.ne.s32.totalorder %s1555_s26, %s1551_s25  ;;  %p354_p10 = scmp.eq.s32.totalorder %s353_s28, 0 }
  0x26   : > { %s381_s20 = sor.u32 %s380_s12, %s353_s28  ;;  %p1767_p12 = por %p394_p8, %p1729_p2 }
  0x27   : > { %p382_p11 = scmp.eq.s32.totalorder %s381_s20, 0  ;;  %p1779_p13 = por %p400_p9, %p1744_p6 }
  0x28   : > { %s1772_s21 = scalar_select %p354_p10, %s1571_s30, %s356_s23  }
  0x29   : > { %s1775_s16 = scalar_select %p382_p11, %s1559_s27, %s384_s11  }
  0x2a   : > { %2009 = sst [smem:[#allocation16_spill]] %s1772_s21  ;;  %p1211_p0 = scmp.ge.s32.totalorder %s1591_s18, 1 }
  0x2b   : > { %2010 = sst [smem:[#allocation17_spill]] %s1775_s16  ;;  %p504_p1 = scmp.lt.s32.totalorder %s1591_s18, 9 }
  0x2c   : > { %s2011_s9 = scalar_select %p1779_p13, 1, 0 }
  0x2d   : > { %p505_p4 = pnand %p1211_p0, %p504_p1 }
  0x2e   : > { %2012 = sst [smem:[#allocation18_spill]] %s2011_s9  ;;  %s1978_s12 = sand.u32 (!%p505_p4), 1, %s1567_s29  }
  0x2f   : > { %508 = sbr.rel (%p505_p4) target bundleno = 958 (0x3be), region = 68  ;;  %p617_p2 = scmp.lt.s32.totalorder (!%p505_p4), %s1575_s14, 3 }
  0x30   : > { %s1789_s11 = sshll.u32 (!%p505_p4), %s1978_s12, 4  ;;  %p597_p5 = scmp.lt.s32.totalorder (!%p505_p4), %s1579_s15, 1 }
  0x31   : > { %s2013_s5 = sld [smem:[#allocation24_spill]] (!%p505_p4)  ;;  %s1982_s16 = sand.u32 (!%p505_p4), 1, %s1555_s26  }
  0x32   : > { %s2014_s4 = sld [smem:[#allocation23_spill]] (!%p505_p4)  ;;  %p1288_p6 = scmp.ne.s32.totalorder (!%p505_p4), %s1575_s14, 0 }
  0x33   : > { %s2015_s6 = sld [smem:[#allocation25_spill]] (!%p505_p4) }
  0x34   : > { %s1793_s28 = scalar_select %p617_p2, %s1575_s14, 3  ;;  %vm686_vm0 = vcmask 523264   ;;  %vm820_vm1 = vcmask 130048   ;;  %vm873_vm4 = vcmask 125952  }
  0x35   : > { %s1796_s23 = scalar_select %p597_p5, %s1579_s15, 1 }
  0x36   : > { %s1799_s24 = sshll.u32 %s1793_s28, 5  ;;  %s2016_s0 = sld [smem:[#allocation19_spill]] }
  0x37   : > { %s1814_s9 = sshll.u32 %s1796_s23, 4  ;;  %s2017_s1 = sld [smem:[#allocation20_spill]] }
  0x38   : > { %s621_s12 = scalar_lea.vmem %s2014_s4, %s1799_s24  ;;  %s2018_s4 = scalar_lea.vmem %s2013_s5, %s1793_s28 }
  0x39   : > { %s629_s27 = scalar_lea.vmem %s2015_s6, %s1799_s24  ;;  %v1310_v0 = vld [vmem:[%s621_s12 + $0x18] sm:$0xff]  ;;  %v1309_v2 = vld [vmem:[%s621_s12 + $0x10] sm:$0xff]  ;;  %v1308_v4 = vld [vmem:[%s621_s12 + $0x8] sm:$0xff]  ;;  %s632_s6 = scalar_lea.vmem %s1962_s7, %s1793_s28 }
  0x3a   : > { %v1314_v1 = vld [vmem:[%s629_s27 + $0x18] sm:$0xff]  ;;  %694 = vmatpush.bf16.msra.mxu0 %v1310_v0  ;;  %v1313_v3 = vld [vmem:[%s629_s27 + $0x10] sm:$0xff]  ;;  %v1312_v5 = vld [vmem:[%s629_s27 + $0x8] sm:$0xff]  ;;  %s637_s17 = scalar_lea.vmem %s1963_s8, %s1799_s24  ;;  %s1302_s21 = sshll.u32 %s1796_s23, 2 }
  0x3b   : > { %752 = vmatpush.bf16.msra.mxu1 %v1314_v1  ;;  %v1307_v6 = vld [vmem:[%s621_s12] sm:$0xff]  ;;  %v1318_v29 = vld [vmem:[%s637_s17 + $0x18] sm:$0xff]  ;;  %v1317_v30 = vld [vmem:[%s637_s17 + $0x10] sm:$0xff]  ;;  %s2019_s2 = sld [smem:[#allocation21_spill]] }
  0x3c   : > { %s601_s30 = scalar_lea.vmem %s2016_s0, %s1814_s9  ;;  %v1311_v7 = vld [vmem:[%s629_s27] sm:$0xff]  ;;  %808 = vmatpush.bf16.msra.mxu2 %v1318_v29  ;;  %v1316_v31 = vld [vmem:[%s637_s17 + $0x8] sm:$0xff]  ;;  %s2020_s3 = sld [smem:[#allocation22_spill]] }
  0x3d   : > { %s606_s20 = scalar_lea.vmem %s2017_s1, %s1814_s9  ;;  %v647_v8 = vld [vmem:[%s601_s30] sm:$0xff]  ;;  %v648_v9 = vld [vmem:[%s601_s30 + $0x8] sm:$0xff]  ;;  %s2021_s24 = sld [smem:[#allocation26_spill]] }
  0x3e   : > { %695 = vmatpush.bf16.msra.mxu0 %v1309_v2  ;;  %v706_v10 = vld [vmem:[%s606_s20] sm:$0xff]  ;;  %v707_v11 = vld [vmem:[%s606_s20 + $0x8] sm:$0xff]  ;;  %v657_v12 = vpack.c.bf16 %v648_v9, %v647_v8 }
  0x3f   : > { %753 = vmatpush.bf16.msra.mxu1 %v1313_v3  ;;  %v716_v13 = vpack.c.bf16 %v707_v11, %v706_v10  ;;  %v1430_v16 = vld [vmem:[%s632_s6] ss:$0 sm:$0xff]  ;;  %s1306_s6 = sshll.u32 %s1793_s28, 3 }
  0x40   : > { %v1429_v19 = vld [vmem:[%s2018_s4] ss:$0 sm:$0xff]  ;;  %809 = vmatpush.bf16.msra.mxu2 %v1317_v30 }
  0x41   : > { %s611_s19 = scalar_lea.vmem %s2019_s2, %s1814_s9  ;;  %v1315_v32 = vld [vmem:[%s637_s17] sm:$0xff]  ;;  %s2023_s9 = sld [smem:[#allocation28_spill]] (!%p1288_p6) }
  0x42   : > { %696 = vmatpush.bf16.msra.mxu0 %v1308_v4  ;;  %s616_s12 = scalar_lea.vmem %s2020_s3, %s1302_s21  ;;  %v762_v33 = vld [vmem:[%s611_s19] sm:$0xff]  ;;  %v763_v34 = vld [vmem:[%s611_s19 + $0x8] sm:$0xff]  ;;  %s2022_s21 = sld [smem:[#allocation27_spill]] }
  0x43   : > { %754 = vmatpush.bf16.msra.mxu1 %v1312_v5  ;;  %v1322_v35 = vld [vmem:[%s616_s12] sm:$0xf]   ;;  %v772_v36 = vpack.c.bf16 %v763_v34, %v762_v33  ;;  %s640_s4 = scalar_lea.vmem %s2021_s24, %s1793_s28  ;;  %s1213_s19 = sshll.u32 %s1982_s16, 3 }
  0x44   : > { %810 = vmatpush.bf16.msra.mxu2 %v1316_v31  ;;  %v1323_v37 = vunpack.c.0.s8 %v1322_v35  ;;  %v1324_v41 = vunpack.c.1.s8 %v1322_v35  ;;  %v1431_v54 = vld [vmem:[%s640_s4] ss:$0 sm:$0xff]  ;;  %s1865_s20 = scalar_lea.vmem [#allocation4], %s1213_s19  ;;  %s589_s28 = scalar_lea.vmem [#allocation2], %s1789_s11 }
  0x46   : > { %697 = vmatpush.bf16.msra.mxu0 %v1307_v6  ;;  %vm845_vm2 = vcmp.eq.s32.totalorder %v1323_v37, 0  ;;  %vm846_vm3 = vcmp.eq.s32.totalorder %v1324_v41, 0 }
  0x47   : > { %755 = vmatpush.bf16.msra.mxu1 %v1311_v7 }
  0x48   : > { %811 = vmatpush.bf16.msra.mxu2 %v1315_v32  ;;  %s645_s30 = scalar_lea.vmem %s2022_s21, %s1306_s6 }
  0x49   : > { %1246 = vmatmul.msk.bf16.vlgmr.msra.gmra.mxu0 %vm686_vm0, %v657_v12  ;;  %v1319_v61 = vld [vmem:[%s645_s30] sm:$0xff] }
  0x4a   : > { %1263 = vmatmul.msk.bf16.vlgmr.msra.gmra.mxu1 %vm686_vm0, %v716_v13  ;;  %918 = vmatpush.bf16.msrb.mxu0 %v1319_v61 }
  0x4b   : > { %1280 = vmatmul.msk.bf16.vlgmr.msra.gmra.mxu2 %vm686_vm0, %v772_v36 }
  0xc6   : > { %v699_v14 = vpop.f32.mrf.mxu0 }
  0xc7   : > { %v757_v15 = vpop.f32.mrf.mxu1  ;;  %v700_v24 = vadd.f32 %v1429_v19, %v699_v14 }
  0xc8   : > { %v758_v20 = vadd.f32 %v1430_v16, %v757_v15 }
  0xc9   : > { %v704_v27 = vmul.f32 0.25, %v700_v24 }
  0xce   : > { %v701_v17 = vpop.f32.mrf.mxu0  ;;  %v813_v50 = vpop.f32.mrf.mxu2 }
  0xcf   : > { %v759_v18 = vpop.f32.mrf.mxu1  ;;  %v702_v22 = vadd.f32 %v1429_v19, %v701_v17  ;;  %v814_v55 = vadd.f32 %v1431_v54, %v813_v50 }
  0xd0   : > { %v760_v21 = vadd.f32 %v1430_v16, %v759_v18 }
  0xd1   : > { %v705_v26 = vmul.f32 0.25, %v702_v22 }
  0xd2   : > { %v819_v23 = vpack.c.bf16 %v760_v21, %v758_v20 }
  0xd3   : > { %v818_v28 = vpack.c.bf16 %v705_v26, %v704_v27 }
  0xd4   : > { %v825_v25 = vsel %vm820_vm1, %v819_v23, 0 }
  0xd5   : > { %834 = vmatpush.bf16.xpose.msra.mxu3 %v825_v25 }
  0xd6   : > { %v815_v56 = vpop.f32.mrf.mxu2 }
  0xd7   : > { %v816_v57 = vadd.f32 %v1431_v54, %v815_v56 }
  0xd9   : > { %v876_v60 = vpack.c.bf16 %v816_v57, %v814_v55 }
  0xdc   : > { %1281 = vmatmul.msk.bf16.vlgmr.msra.gmra.mxu3 %vm820_vm1, %v818_v28 }
  0xdd   : > { %892 = vmatpush.bf16.msrb.mxu3 %v876_v60 }
 0x15f   : > { %v836_v38 = vpop.f32.mrf.mxu3 }
 0x160   : > { %v847_v39 = vsel %vm845_vm2, -1e+10, %v836_v38 }
 0x161   : > { %v849_v40 = vsel %vm820_vm1, %v847_v39, -inf }
 0x162   : > { %850 = vmax.xlane.f32.xlu0 %v849_v40 }
 0x167   : > { %v838_v42 = vpop.f32.mrf.mxu3 }
 0x168   : > { %v848_v43 = vsel %vm846_vm3, -1e+10, %v838_v42 }
 0x169   : > { %v852_v44 = vsel %vm820_vm1, %v848_v43, -inf }
 0x16a   : > { %853 = vmax.xlane.f32.xlu0 %v852_v44 }
 0x1d5   : > { %v851_v45 = vpop.xlane.xlu0 %850 }
 0x1d6   : > { %v855_v46 = vsub.f32 %v847_v39, %v851_v45 }
 0x1d8   : > { %v857_v47 = vmul.f32 1.442695, %v855_v46 }
 0x1da   : > { %1432 = vpow2.f32 %v857_v47 }
 0x1dd   : > { %v854_v48 = vpop.xlane.xlu0 %853 }
 0x1de   : > { %v856_v49 = vsub.f32 %v848_v43, %v854_v48 }
 0x1e0   : > { %v1433_v51 = vpop.eup %1432  ;;  %v859_v52 = vmul.f32 1.442695, %v856_v49 }
 0x1e1   : > { %v861_v53 = vsel %vm820_vm1, %v1433_v51, 0.0 }
 0x1e2   : > { %1434 = vpow2.f32 %v859_v52  ;;  %862 = vadd.xlane.f32.xlu1 %v861_v53 }
 0x1e8   : > { %v1435_v58 = vpop.eup %1434 }
 0x1e9   : > { %v864_v59 = vsel %vm820_vm1, %v1435_v58, 0.0 }
 0x1ea   : > { %865 = vadd.xlane.f32.xlu1 %v864_v59 }
 0x255   : > { %v863_v62 = vpop.xlane.xlu1 %862 }
 0x256   : > { %1436 = vrcp.f32 %v863_v62 }
 0x25c   : > { %v1437_v63 = vpop.eup %1436 }
 0x25d   : > { %v869_v0 = vmul.f32 %v1437_v63, %v1433_v51  ;;  %v866_v1 = vpop.xlane.xlu1 %865 }
 0x25e   : > { %1438 = vrcp.f32 %v866_v1 }
 0x25f   : > { %v871_v2 = vpack.c.bf16 %v869_v0, %v869_v0 }
 0x261   : > { %874 = vst.msk [vmem:[%s1865_s20] sm:$0xf] %vm873_vm4, %v871_v2  ;;  %v879_v7 = vunpack.c.l.b16 %v871_v2 }
 0x264   : > { %v1439_v3 = vpop.eup %1438 }
 0x265   : > { %v870_v4 = vmul.f32 %v1439_v3, %v1435_v58 }
 0x267   : > { %v872_v5 = vpack.c.bf16 %v870_v4, %v870_v4 }
 0x269   : > { %875 = vst.msk [vmem:[%s1865_s20 + $0x4] sm:$0xf] %vm873_vm4, %v872_v5  ;;  %v880_v6 = vunpack.c.l.b16 %v872_v5 }
 0x26b   : > { %v881_v8 = vpack.c.b16 %v880_v6, %v879_v7 }
 0x26d   : > { %1282 = vmatmul.msk.bf16.vlgmr.msrb.gmra.mxu3 %vm820_vm1, %v881_v8 }
 0x2f0   : > { %v894_v9 = vpop.f32.mrf.mxu3 }
 0x2f8   : > { %v896_v10 = vpop.f32.mrf.mxu3 }
 0x2f9   : > { %v901_v11 = vpack.c.bf16 %v896_v10, %v894_v9 }
 0x2fb   : > { %1287 = vmatmul.msk.bf16.vlgmr.msrb.gmra.mxu0 %vm820_vm1, %v901_v11 }
 0x378   : > { %v920_v12 = vpop.f32.mrf.mxu0 }
 0x37c   : > { %928 = sbr.rel (%p1288_p6) target bundleno = 902 (0x386), region = 72 }
 0x380   : > { %v922_v13 = vpop.f32.mrf.mxu0 }
 0x381   : > { %v1440_v14 = vld [vmem:[%s2023_s9] ss:$0 sm:$0xff] }
 0x382   : > { %v933_v15 = vadd.f32 %v1440_v14, %v920_v12  ;;  %v934_v16 = vadd.f32 %v1440_v14, %v922_v13 }
 0x384   : > { %935 = vst.msk [vmem:[%s589_s28] sm:$0xff] %vm686_vm0, %v933_v15 }
 0x385   : > { %936 = vst.msk [vmem:[%s589_s28 + $0x8] sm:$0xff] %vm686_vm0, %v934_v16 }
 0x386 PF: > { %p1289_p8 = scmp.eq.s32.totalorder %s1575_s14, 0 }
 0x388   : > { %940 = sbr.rel (%p1289_p8) target bundleno = 914 (0x392), region = 76 }
 0x38d   : > { %v941_v17 = vld [vmem:[%s589_s28] sm:$0xff]  ;;  %v942_v18 = vld [vmem:[%s589_s28 + $0x8] sm:$0xff] }
 0x38e   : > { %v943_v19 = vadd.f32 %v941_v17, %v920_v12  ;;  %v944_v20 = vadd.f32 %v942_v18, %v922_v13 }
 0x390   : > { %945 = vst.msk [vmem:[%s589_s28] sm:$0xff] %vm686_vm0, %v943_v19 }
 0x391   : > { %946 = vst.msk [vmem:[%s589_s28 + $0x8] sm:$0xff] %vm686_vm0, %v944_v20 }
 0x392 PF: > { %s1320_s23 = sshll.u32 %s1579_s15, 4  ;;  %s2025_s6 = sld [smem:[#allocation29_spill]] }
 0x393   : > { %s965_s17 = sshll.u32 %s589_s28, 4  ;;  %s2026_s30 = sand.u32 1, %s1567_s29   ;;  %s966_s17 = int_to_ptr.vmem [resolvable:$true] %s965_s17 }
 0x394   : > { %s948_s19 = scalar_lea.sflag [#allocation3], %s2026_s30 }
 0x398   : > { %s964_s22 = scalar_lea.hbm %s2025_s6, %s1320_s23  ;;  %s1461_s0 = scalar_lea.hbm %s2025_s6, 32 }
 0x399   : > { %s967_s21 = sshll.u32 %s964_s22, 4  ;;  %s968_s21 = int_to_ptr.hbm [resolvable:$true] %s967_s21 }
 0x39a   : > { %s1455_s27 = sshra.s32 %s968_s21, 4  ;;  %s1456_s27 = int_to_ptr.hbm [resolvable:$true] %s1455_s27 }
 0x39b   : > { %s1457_s12 = scalar_lea.hbm %s1456_s27, 16  ;;  %p1462_p0 = scmp.lt.s32.totalorder %s1456_s27, %s2025_s6 }
 0x39c   : > { %p1458_p9 = scmp.ne.s32.totalorder %s1456_s27, %s1457_s12  ;;  %p1463_p1 = scmp.lt.s32.totalorder %s1461_s0, %s1457_s12 }
 0x39e   : > { %p1459_p10 = pnand %p1458_p9, %p1738_p3  ;;  %p1464_p4 = por %p1463_p1, %p1462_p0 }
 0x3a0   : > { %p1460_p11 = pneg %p1459_p10 }
 0x3a2   : > { %p1465_p2 = pnand %p1464_p4, %p1460_p11 }
 0x3a4   : > { %1468 = shalt.err (!%p1465_p2)
}
 0x3a5   : > { %s1593_s28 = smov 128   ;;  %s1594_s23 = smov 8  }
 0x3a6   : > { %1325 = dma.vmem_to_hbm [thread:$0]  (%p1738_p3), %s966_s17, 256, %s968_s21, %s948_s19, %s1593_s28, %s1593_s28, %s1594_s23  }
 0x3a7   : > { %s1294_s16 = sshll.u32 %s1575_s14, 1  ;;  %s1295_s4 = sshll.u32 %s1579_s15, 3 }
 0x3a8   : > { %s981_s22 = sadd.s32 %s1295_s4, %s1294_s16  ;;  %s984_s30 = sshll.u32 %s1865_s20, 4  ;;  %s985_s30 = int_to_ptr.vmem [resolvable:$true] %s984_s30 }
 0x3a9   : > { %s1296_s1 = sshll.u32 %s981_s22, 2  ;;  %s2027_s12 = sld [smem:[#allocation30_spill]] }
 0x3aa   : > { %s2028_s2 = sand.u32 1, %s1555_s26  }
 0x3ab   : > { %s953_s3 = scalar_lea.sflag [#allocation5], %s2028_s2 }
 0x3af   : > { %s983_s9 = scalar_lea.hbm %s2027_s12, %s1296_s1  ;;  %s1489_s20 = scalar_lea.hbm %s2027_s12, 64 }
 0x3b0   : > { %s986_s24 = sshll.u32 %s983_s9, 4  ;;  %s987_s24 = int_to_ptr.hbm [resolvable:$true] %s986_s24 }
 0x3b1   : > { %s1483_s5 = sshra.s32 %s987_s24, 4  ;;  %s1484_s5 = int_to_ptr.hbm [resolvable:$true] %s1483_s5 }
 0x3b2   : > { %s1485_s6 = scalar_lea.hbm %s1484_s5, 8  ;;  %p1490_p8 = scmp.lt.s32.totalorder %s1484_s5, %s2027_s12 }
 0x3b3   : > { %p1486_p5 = scmp.ne.s32.totalorder %s1484_s5, %s1485_s6  ;;  %p1491_p9 = scmp.lt.s32.totalorder %s1489_s20, %s1485_s6 }
 0x3b5   : > { %p1487_p3 = pnand %p1486_p5, %p1767_p12  ;;  %p1492_p10 = por %p1491_p9, %p1490_p8 }
 0x3b7   : > { %p1488_p6 = pneg %p1487_p3 }
 0x3b9   : > { %p1493_p11 = pnand %p1492_p10, %p1488_p6 }
 0x3bb   : > { %1496 = shalt.err (!%p1493_p11)
}
 0x3bc   : > { %s1595_s2 = smov 64   ;;  %s1596_s21 = smov 4  }
 0x3bd   : > { %1326 = dma.vmem_to_hbm [thread:$0]  (%p1767_p12), %s985_s30, 128, %s987_s24, %s953_s3, %s1595_s2, %s1595_s2, %s1596_s21  }
 0x3be PF: > { %s2029_s19 = sld [smem:[#allocation9_spill]]  ;;  %p1336_p0 = scmp.ge.s32.totalorder %s1591_s18, 2 }
 0x3c0   : > { %p1330_p1 = pnand %p1336_p0, %p1755_p7 }
 0x3c2   : > { %p1331_p4 = pneg %p1330_p1 }
 0x3c4   : > { %s1001_s28 = sand.u32 1, %s2029_s19  }
 0x3c5   : > { %s1002_s23 = scalar_lea.sflag [#allocation3], %s1001_s28 }
 0x3c6   : > { %1542 = dma.done.wait (%p1331_p4), %s1002_s23, 256  }
 0x3c7   : > { %1544 = vsyncadd (%p1331_p4), %s1002_s23, 4294967040  ;;  %s1011_s6 = sand.u32 1, %s1551_s25   ;;  %p1333_p2 = pnand %p1336_p0, %p1779_p13 }
 0x3c8   : > { %s1012_s13 = scalar_lea.sflag [#allocation5], %s1011_s6 }
 0x3c9   : > { %p1334_p5 = pneg %p1333_p2 }
 0x3cb   : > { %1546 = dma.done.wait (%p1334_p5), %s1012_s13, 128  }
 0x3cc   : > { %1548 = vsyncadd (%p1334_p5), %s1012_s13, 4294967168  ;;  %s30_s18 = sadd.s32 1, %s1591_s18   ;;  %s2031_s3 = sld [smem:[#allocation8_spill]] }
 0x3cd   : > { %p27_p12 = scmp.ge.s32.totalorder %s30_s18, 10   ;;  %s2032_s27 = sld [smem:[#allocation17_spill]] }
 0x3ce   : > { %s2033_s10 = sld [smem:[#allocation10_spill]]  ;;  %s2039_s25 = smov %s1555_s26 }
 0x3cf   : > { %s2034_s30 = sld [smem:[#allocation16_spill]]  ;;  %s2041_s28 = smov %s1567_s29 }
 0x3d0   : > { %s2035_s14 = sld [smem:[#allocation11_spill]]  ;;  %29 = sbr.rel (!%p27_p12) target bundleno = 22 (0x16), region = 158 }
 0x3d1   : > { %s2036_s15 = sld [smem:[#allocation12_spill]] }
 0x3d2   : > { %s2037_s16 = sld [smem:[#allocation13_spill]]  ;;  %s2040_s26 = smov %s2031_s3 }
 0x3d3   : > { %s2038_s17 = sld [smem:[#allocation15_spill]] }
 0x3d4   : > { %s2042_s29 = smov %s2033_s10 }
 0x3d5   :  { %1018 = vsyncpa [#allocation3], 1 }
 0x3d6   :  { %1020 = vsyncpa [#allocation3 + $0x1], 1 }
 0x3d7   :  { %1021 = vsyncpa [#allocation5], 1 }
 0x3d8   :  { %1023 = vsyncpa [#allocation5 + $0x1], 1 }

</bundles_post_ra>
